<compile_context>
chip_gen: v6e
topology: v6e:2x2x1
jax: 0.10.0
libtpu: 0.0.40
codegen_flags: <defaults>
</compile_context>

<pallas_src>
import jax
import jax.numpy as jnp
from jax import lax
from jax.experimental import pallas as pl
from jax.experimental.pallas import tpu as pltpu

_EPS = 1e-12                   # matches ATen cosine_embedding_loss EPSILON
_LANES = 128
_SUBLANE = 32                  # row-tile multiple: legal for f32 / bf16 / int8 blocks
_MAX_TILE_R = 4096             # review #3: bigger tiles (was 1024)
_VMEM_BLOCK_BUDGET = 20 << 20  # target bytes for double-buffered input/output blocks


def _round_up(x, m):
    return ((x + m - 1) // m) * m


def _make_kernel(num_coords, has_weight, want_elem, tail_limit, loss_weight):
    """Kernel body for one (has_weight, want_elem) variant.

    tail_limit: None (no masking needed) or a static int = number of valid elements
    in the LAST tile (padding never spans more than one tile).
    """

    def kernel(*refs):
        if has_weight:
            p_ref, t_ref, w_ref, out_ref = refs
        else:
            p_ref, t_ref, out_ref = refs
            w_ref = None

        # Explicit accumulation over the tiny coordinate axis -> pure VPU FMAs on
        # dense [tile_r, 128] slabs; no cross-lane reduction needed.
        p0 = p_ref[0].astype(jnp.float32)
        t0 = t_ref[0].astype(jnp.float32)
        prod = p0 * t0
        mag1 = p0 * p0
        mag2 = t0 * t0
        for c in range(1, num_coords):
            pc = p_ref[c].astype(jnp.float32)
            tc = t_ref[c].astype(jnp.float32)
            prod = prod + pc * tc
            mag1 = mag1 + pc * pc
            mag2 = mag2 + tc * tc

        cos = prod * lax.rsqrt((mag1 + _EPS) * (mag2 + _EPS))      # EUP rsqrt
        loss = 1.0 - cos                                           # [tile_r, 128]

        if has_weight:
            loss = loss * w_ref[...].astype(jnp.float32)           # in-kernel upcast

        if want_elem:
            # Review #8: fold loss_weight into the final store so the wrapper's only
            # remaining op on the output is the un-pad slice.
            if loss_weight != 1.0:
                loss = loss * jnp.float32(loss_weight)
            out_ref[...] = loss
        else:
            # Review #2: each tile writes its own partial sum ("parallel" axis,
            # deterministic accumulation; wrapper finishes with jnp.sum).
            if tail_limit is None:
                out_ref[0, 0] = jnp.sum(loss)
            else:
                last = pl.num_programs(0) - 1

                @pl.when(pl.program_id(0) != last)
                def _interior():
                    out_ref[0, 0] = jnp.sum(loss)

                @pl.when(pl.program_id(0) == last)
                def _tail():
                    # Review #6: mask only on the last tile; tile-local index against
                    # a static limit (no int32 overflow regardless of total size).
                    rows = lax.broadcasted_iota(jnp.int32, loss.shape, 0)
                    lanes = lax.broadcasted_iota(jnp.int32, loss.shape, 1)
                    ok = rows * _LANES + lanes < tail_limit
                    out_ref[0, 0] = jnp.sum(jnp.where(ok, loss, 0.0))

    return kernel


def _run(p3, t3, w2, *, tile_r, tail_limit, want_elem, loss_weight):
    """p3/t3: [C, R_total, 128]; w2: [R_total, 128] (native dtype) or None."""
    num_coords, r_total, _ = p3.shape
    grid = r_total // tile_r
    has_weight = w2 is not None

    kernel = _make_kernel(num_coords, has_weight, want_elem, tail_limit, loss_weight)

    in_specs = [
        pl.BlockSpec((num_coords, tile_r, _LANES), lambda i: (0, i, 0)),
        pl.BlockSpec((num_coords, tile_r, _LANES), lambda i: (0, i, 0)),
    ]
    args = [p3, t3]

    block_bytes = 2 * num_coords * tile_r * _LANES * p3.dtype.itemsize
    if has_weight:
        in_specs.append(pl.BlockSpec((tile_r, _LANES), lambda i: (i, 0)))
        args.append(w2)
        block_bytes += tile_r * _LANES * w2.dtype.itemsize

    if want_elem:
        out_shape = jax.ShapeDtypeStruct((r_total, _LANES), jnp.float32)
        out_specs = pl.BlockSpec((tile_r, _LANES), lambda i: (i, 0))
        block_bytes += tile_r * _LANES * 4
    else:
        # Per-tile partial sums (scalar per grid step) staged through SMEM.
        out_shape = jax.ShapeDtypeStruct((grid, 1), jnp.float32)
        out_specs = pl.BlockSpec((1, 1), lambda i: (i, 0),
                                 memory_space=pltpu.MemorySpace.SMEM)

    # Review #3/#4: explicit scoped-VMEM limit so the larger double-buffered tiles
    # are legal on v5e (16 MiB default) and comfortably inside v7x's 64 MiB physical.
    vmem_limit = int(min(max(2 * block_bytes + (4 << 20), 16 << 20), 48 << 20))

    return pl.pallas_call(
        kernel,
        grid=(grid,),
        out_shape=out_shape,
        in_specs=in_specs,
        out_specs=out_specs,
        compiler_params=pltpu.CompilerParams(
            dimension_semantics=("parallel",),          # both paths: megacore-friendly
            vmem_limit_bytes=vmem_limit,
        ),
    )(*args)


def _forward_impl(pred, target, weight=None, avg_factor=None, *,
                  reduction='mean', loss_weight=1.0, max_tile_r=_MAX_TILE_R):
    """JAX/Pallas equivalent of PtsDirCosLoss.forward (call via the jitted wrapper).

    pred, target: [num_samples, num_dir, num_coords]
    weight (optional): [num_samples, num_dir]
    """
    if target.size == 0:
        return jnp.sum(pred) * 0.0

    if avg_factor is None:
        raise ValueError('avg_factor should not be none for OrderedPtsL1Loss')
    if reduction not in ('mean', 'none'):
        raise ValueError('avg_factor can not be used with reduction="sum"')

    N, D, C = pred.shape
    M = N * D
    R = -(-M // _LANES)                                  # rows of the (R, 128) slab

    # --- tile geometry: biggest tile under the VMEM budget, multiple of 32 ---------
    in_item = jnp.dtype(pred.dtype).itemsize
    w_item = jnp.dtype(weight.dtype).itemsize if weight is not None else 0
    row_bytes = _LANES * (2 * C * in_item + w_item)      # pred+target(+weight) per row
    tile_r = _VMEM_BLOCK_BUDGET // (2 * row_bytes)       # 2x for double-buffering
    tile_r = max(_SUBLANE, min((tile_r // _SUBLANE) * _SUBLANE, int(max_tile_r)))
    # Review #2: prefer >= 2 tiles so v7x's two TensorCores both get work.
    half = _round_up(-(-R // 2), _SUBLANE)
    tile_r = min(tile_r, max(_SUBLANE, half))

    r_total = _round_up(R, tile_r)
    pad = r_total * _LANES - M
    grid = r_total // tile_r

    # --- lane-dense layout [C, r_total, 128] -----------------------------------------
    # Review #1b: this whole function runs under one jit, so the transpose + pad fuse
    # into a single XLA copy feeding the pallas custom call (one HBM pass per input).
    p3 = jnp.pad(pred.reshape(M, C).T, ((0, 0), (0, pad))).reshape(C, r_total, _LANES)
    t3 = jnp.pad(target.reshape(M, C).T, ((0, 0), (0, pad))).reshape(C, r_total, _LANES)
    if weight is not None:
        # Keep native dtype (review: no forced f32 stream); zeros in the padded tail
        # also neutralize the padded rows, so no in-kernel mask is needed.
        w2 = jnp.pad(weight.reshape(M), (0, pad)).reshape(r_total, _LANES)
    else:
        w2 = None

    want_elem = (reduction == 'none')
    need_mask = (w2 is None) and (not want_elem) and (pad != 0)
    # All padded elements live in the last tile; static per-last-tile valid count.
    tail_limit = (M - (grid - 1) * tile_r * _LANES) if need_mask else None

    if want_elem:
        slab = _run(p3, t3, w2, tile_r=tile_r, tail_limit=None,
                    want_elem=True, loss_weight=float(loss_weight))
        # Only wrapper op on the output: un-pad slice (loss_weight applied in-kernel).
        return slab.reshape(-1)[:M].reshape(N, D)
    else:
        partials = _run(p3, t3, w2, tile_r=tile_r, tail_limit=tail_limit,
                        want_elem=False, loss_weight=1.0)
        total = jnp.sum(partials)                        # deterministic partial sums
        return loss_weight * total / avg_factor


_forward_jit = jax.jit(_forward_impl,
                       static_argnames=('reduction', 'loss_weight', 'max_tile_r'))


def pts_dir_cos_loss_forward(pred, target, weight=None, avg_factor=None,
                             reduction='mean', loss_weight=1.0,
                             max_tile_r=_MAX_TILE_R):
    """Public entry point (jitted so layout plumbing fuses with the kernel call)."""
    return _forward_jit(pred, target, weight, avg_factor,
                        reduction=reduction, loss_weight=float(loss_weight),
                        max_tile_r=int(max_tile_r))


def _reference_elem(pred, target):
    """Pure-JAX elementwise reference mirroring torch CosineEmbeddingLoss(y=+1)."""
    p = pred.reshape(-1, pred.shape[-1]).astype(jnp.float32)
    t = target.reshape(-1, target.shape[-1]).astype(jnp.float32)
    prod = jnp.sum(p * t, axis=-1)
    m1 = jnp.sum(p * p, axis=-1) + _EPS
    m2 = jnp.sum(t * t, axis=-1) + _EPS
    loss = 1.0 - prod / jnp.sqrt(m1 * m2)
    return loss.reshape(pred.shape[0], pred.shape[1])


if __name__ == "__main__":
    key = jax.random.PRNGKey(0)
    k1, k2, k3, k4, k5, k6 = jax.random.split(key, 6)

    # Case 1: canonical small shapes [num_samples=4, num_dir=8, num_coords=2]
    N, D, C = 4, 8, 2
    pred = jax.random.normal(k1, (N, D, C), jnp.float32)
    target = jax.random.normal(k2, (N, D, C), jnp.float32)
    weight = jax.random.uniform(k3, (N, D), jnp.float32)
    avg_factor = float(N * D)
    elem = _reference_elem(pred, target)

    # mean, with weight
    out = pts_dir_cos_loss_forward(pred, target, weight=weight,
                                   avg_factor=avg_factor, reduction='mean')
    out = jax.block_until_ready(out)
    ref = jnp.sum(elem * weight) / avg_factor
    assert jnp.allclose(out, ref, rtol=1e-5, atol=1e-6), (out, ref)

    # mean, no weight (exercises the last-tile mask path)
    out_nw = pts_dir_cos_loss_forward(pred, target, weight=None,
                                      avg_factor=avg_factor, reduction='mean')
    out_nw = jax.block_until_ready(out_nw)
    ref_nw = jnp.sum(elem) / avg_factor
    assert jnp.allclose(out_nw, ref_nw, rtol=1e-5, atol=1e-6), (out_nw, ref_nw)

    # none, with weight (lane-dense elementwise output, loss_weight folded in-kernel)
    out_none = pts_dir_cos_loss_forward(pred, target, weight=weight,
                                        avg_factor=avg_factor, reduction='none')
    out_none = jax.block_until_ready(out_none)
    assert jnp.allclose(out_none, elem * weight, rtol=1e-5, atol=1e-6)

    # none, no weight
    out_none_nw = pts_dir_cos_loss_forward(pred, target, weight=None,
                                           avg_factor=avg_factor, reduction='none')
    out_none_nw = jax.block_until_ready(out_none_nw)
    assert jnp.allclose(out_none_nw, elem, rtol=1e-5, atol=1e-6)

    # Case 2: multi-tile grid (small max_tile_r) to exercise the per-tile partial
    # sums across several "parallel" grid steps plus last-tile masking.
    N2, D2, C2 = 100, 100, 2
    pred2 = jax.random.normal(k4, (N2, D2, C2), jnp.float32)
    target2 = jax.random.normal(k5, (N2, D2, C2), jnp.float32)
    weight2 = jax.random.uniform(k6, (N2, D2), jnp.float32)
    avg2 = float(N2 * D2)
    elem2 = _reference_elem(pred2, target2)

    out2 = pts_dir_cos_loss_forward(pred2, target2, weight=None,
                                    avg_factor=avg2, reduction='mean', max_tile_r=32)
    out2 = jax.block_until_ready(out2)
    ref2 = jnp.sum(elem2) / avg2
    assert jnp.allclose(out2, ref2, rtol=1e-4, atol=1e-5), (out2, ref2)

    out3 = pts_dir_cos_loss_forward(pred2, target2, weight=weight2,
                                    avg_factor=avg2, reduction='mean', max_tile_r=32)
    out3 = jax.block_until_ready(out3)
    ref3 = jnp.sum(elem2 * weight2) / avg2
    assert jnp.allclose(out3, ref3, rtol=1e-4, atol=1e-5), (out3, ref3)

    print("KERNEL_OK")
</pallas_src>

<mosaic_0001>
module attributes {stable_mosaic.version = 11 : i64} {
  func.func @kernel(%arg0: i32, %arg1: memref<2x32x128xf32, #tpu.memory_space<vmem>>, %arg2: memref<2x32x128xf32, #tpu.memory_space<vmem>>, %arg3: memref<32x128xf32, #tpu.memory_space<vmem>>, %arg4: memref<1x1xf32, #tpu.memory_space<smem>>) attributes {dimension_semantics = [#tpu.dimension_semantics<parallel>], iteration_bounds = array<i64: 1>, scalar_prefetch = 0 : i64, scratch_operands = 0 : i64, tpu.core_type = #tpu.core_type<tc>, window_params = [{transform_indices = @transform_0, window_bounds = array<i64: 2, 32, 128>}, {transform_indices = @transform_1, window_bounds = array<i64: 2, 32, 128>}, {transform_indices = @transform_2, window_bounds = array<i64: 32, 128>}, {transform_indices = @transform_3, window_bounds = array<i64: 1, 1>}]} {
    %c0 = arith.constant 0 : index
    %c0_0 = arith.constant 0 : index
    %c0_1 = arith.constant 0 : index
    %0 = vector.load %arg1[%c0, %c0_0, %c0_1] : memref<2x32x128xf32, #tpu.memory_space<vmem>>, vector<1x32x128xf32>
    %1 = vector.shape_cast %0 : vector<1x32x128xf32> to vector<32x128xf32>
    %c0_2 = arith.constant 0 : index
    %c0_3 = arith.constant 0 : index
    %c0_4 = arith.constant 0 : index
    %2 = vector.load %arg2[%c0_2, %c0_3, %c0_4] : memref<2x32x128xf32, #tpu.memory_space<vmem>>, vector<1x32x128xf32>
    %3 = vector.shape_cast %2 : vector<1x32x128xf32> to vector<32x128xf32>
    %4 = arith.mulf %1, %3 : vector<32x128xf32>
    %5 = arith.mulf %1, %1 : vector<32x128xf32>
    %6 = arith.mulf %3, %3 : vector<32x128xf32>
    %c1 = arith.constant 1 : index
    %c0_5 = arith.constant 0 : index
    %c0_6 = arith.constant 0 : index
    %7 = vector.load %arg1[%c1, %c0_5, %c0_6] : memref<2x32x128xf32, #tpu.memory_space<vmem>>, vector<1x32x128xf32>
    %8 = vector.shape_cast %7 : vector<1x32x128xf32> to vector<32x128xf32>
    %c1_7 = arith.constant 1 : index
    %c0_8 = arith.constant 0 : index
    %c0_9 = arith.constant 0 : index
    %9 = vector.load %arg2[%c1_7, %c0_8, %c0_9] : memref<2x32x128xf32, #tpu.memory_space<vmem>>, vector<1x32x128xf32>
    %10 = vector.shape_cast %9 : vector<1x32x128xf32> to vector<32x128xf32>
    %11 = arith.mulf %8, %10 : vector<32x128xf32>
    %12 = arith.addf %4, %11 : vector<32x128xf32>
    %13 = arith.mulf %8, %8 : vector<32x128xf32>
    %14 = arith.addf %5, %13 : vector<32x128xf32>
    %15 = arith.mulf %10, %10 : vector<32x128xf32>
    %16 = arith.addf %6, %15 : vector<32x128xf32>
    %cst = arith.constant 9.99999996E-13 : f32
    %17 = vector.broadcast %cst : f32 to vector<32x128xf32>
    %18 = arith.addf %14, %17 : vector<32x128xf32>
    %cst_10 = arith.constant 9.99999996E-13 : f32
    %19 = vector.broadcast %cst_10 : f32 to vector<32x128xf32>
    %20 = arith.addf %16, %19 : vector<32x128xf32>
    %21 = arith.mulf %18, %20 : vector<32x128xf32>
    %22 = math.rsqrt %21 : vector<32x128xf32>
    %23 = arith.mulf %12, %22 : vector<32x128xf32>
    %cst_11 = arith.constant 1.000000e+00 : f32
    %24 = vector.broadcast %cst_11 : f32 to vector<32x128xf32>
    %25 = arith.subf %24, %23 : vector<32x128xf32>
    %c0_12 = arith.constant 0 : index
    %c0_13 = arith.constant 0 : index
    %26 = vector.load %arg3[%c0_12, %c0_13] : memref<32x128xf32, #tpu.memory_space<vmem>>, vector<32x128xf32>
    %27 = arith.mulf %25, %26 : vector<32x128xf32>
    %28 = vector.shape_cast %27 : vector<32x128xf32> to vector<1x32x128xf32>
    %cst_14 = arith.constant dense<0.000000e+00> : vector<1xf32>
    %29 = vector.multi_reduction <add>, %28, %cst_14 [1, 2] : vector<1x32x128xf32> to vector<1xf32>
    %30 = vector.shape_cast %29 : vector<1xf32> to vector<1x1x1xf32>
    %31 = vector.extract %30[0, 0, 0] : f32 from vector<1x1x1xf32>
    %c0_15 = arith.constant 0 : index
    %c0_16 = arith.constant 0 : index
    %32 = memref.load %arg4[%c0_15, %c0_16] : memref<1x1xf32, #tpu.memory_space<smem>>
    memref.store %31, %arg4[%c0_15, %c0_16] : memref<1x1xf32, #tpu.memory_space<smem>>
    return
  }
  func.func @transform_0(%arg0: i32) -> (i32, i32, i32) {
    %c0_i32 = arith.constant 0 : i32
    %c0_i32_0 = arith.constant 0 : i32
    %c0_i32_1 = arith.constant 0 : i32
    return %c0_i32, %arg0, %c0_i32_0 : i32, i32, i32
  }
  func.func @transform_1(%arg0: i32) -> (i32, i32, i32) {
    %c0_i32 = arith.constant 0 : i32
    %c0_i32_0 = arith.constant 0 : i32
    %c0_i32_1 = arith.constant 0 : i32
    return %c0_i32, %arg0, %c0_i32_0 : i32, i32, i32
  }
  func.func @transform_2(%arg0: i32) -> (i32, i32) {
    %c0_i32 = arith.constant 0 : i32
    %c0_i32_0 = arith.constant 0 : i32
    return %arg0, %c0_i32 : i32, i32
  }
  func.func @transform_3(%arg0: i32) -> (i32, i32) {
    %c0_i32 = arith.constant 0 : i32
    %c0_i32_0 = arith.constant 0 : i32
    return %arg0, %c0_i32 : i32, i32
  }
}

</mosaic_0001>

<bundles_post_ra>
// kernel: _forward_impl.1
= control target key start
LH: loop header
LB: loop body
LE: loop exit
PB: predicated region body
PF: predicated region fallthrough
CT: control target
= control target key end

     0   :  { %s241_s0 = inlined_call_operand.vmem [shape: f32[2,32,128], index: 0, kind: input, shape index: {}]   ;;  %s242_s1 = inlined_call_operand.vmem [shape: f32[2,32,128], index: 1, kind: input, shape index: {}]   ;;  %s243_s2 = inlined_call_operand.vmem [shape: f32[32,128], index: 2, kind: input, shape index: {}]   ;;  %s244_s3 = inlined_call_operand.hbm [shape: f32[1,1], index: 3, kind: output, shape index: {}]  }
   0x1   :  { %v15_v0 = vld [vmem:[%s241_s0] sm:$0xff]  ;;  %v16_v1 = vld [vmem:[%s241_s0 + $0x8] sm:$0xff]  ;;  %v17_v2 = vld [vmem:[%s241_s0 + $0x10] sm:$0xff] }
   0x2   :  { %v18_v3 = vld [vmem:[%s241_s0 + $0x18] sm:$0xff]  ;;  %v19_v4 = vld [vmem:[%s242_s1] sm:$0xff]  ;;  %v20_v5 = vld [vmem:[%s242_s1 + $0x8] sm:$0xff]  ;;  %v27_v7 = vmul.f32 %v15_v0, %v15_v0  ;;  %v28_v8 = vmul.f32 %v16_v1, %v16_v1  ;;  %v29_v9 = vmul.f32 %v17_v2, %v17_v2 }
   0x3   :  { %v21_v6 = vld [vmem:[%s242_s1 + $0x10] sm:$0xff]  ;;  %v128_v10 = vld [vmem:[%s241_s0 + $0x20] sm:$0xff]  ;;  %v30_v11 = vmul.f32 %v18_v3, %v18_v3  ;;  %v129_v12 = vld [vmem:[%s241_s0 + $0x28] sm:$0xff]  ;;  %v31_v19 = vmul.f32 %v19_v4, %v19_v4  ;;  %v32_v20 = vmul.f32 %v20_v5, %v20_v5 }
   0x4   :  { %v130_v13 = vld [vmem:[%s241_s0 + $0x30] sm:$0xff]  ;;  %v131_v14 = vld [vmem:[%s241_s0 + $0x38] sm:$0xff]  ;;  %v53_v16 = vmul.f32 %v128_v10, %v128_v10  ;;  %v54_v17 = vmul.f32 %v129_v12, %v129_v12  ;;  %v132_v21 = vld [vmem:[%s242_s1 + $0x20] sm:$0xff]  ;;  %v33_v25 = vmul.f32 %v21_v6, %v21_v6 }
   0x5   :  { %v22_v15 = vld [vmem:[%s242_s1 + $0x18] sm:$0xff]  ;;  %v55_v18 = vmul.f32 %v130_v13, %v130_v13  ;;  %v133_v22 = vld [vmem:[%s242_s1 + $0x28] sm:$0xff]  ;;  %v134_v23 = vld [vmem:[%s242_s1 + $0x30] sm:$0xff]  ;;  %v56_v24 = vmul.f32 %v131_v14, %v131_v14 }
   0x6   :  { %v135_v26 = vld [vmem:[%s242_s1 + $0x38] sm:$0xff]  ;;  %v57_v27 = vadd.f32 %v53_v16, %v27_v7  ;;  %v58_v28 = vadd.f32 %v54_v17, %v28_v8 }
   0x7   :  { %v59_v29 = vadd.f32 %v55_v18, %v29_v9 }
   0x8   :  { %8 = vsyncpa [#allocation3], 0  ;;  %v34_v30 = vmul.f32 %v22_v15, %v22_v15  ;;  %v60_v31 = vadd.f32 %v56_v24, %v30_v11  ;;  %v61_v32 = vmul.f32 %v132_v21, %v132_v21  ;;  %v62_v33 = vmul.f32 %v133_v22, %v133_v22 }
   0x9   :  { %v63_v34 = vmul.f32 %v134_v23, %v134_v23  ;;  %v64_v35 = vmul.f32 %v135_v26, %v135_v26  ;;  %v69_v36 = vadd.f32 1e-12, %v57_v27  ;;  %v70_v37 = vadd.f32 1e-12, %v58_v28 }
   0xa   :  { %v65_v38 = vadd.f32 %v61_v32, %v31_v19  ;;  %v66_v39 = vadd.f32 %v62_v33, %v32_v20  ;;  %v71_v41 = vadd.f32 1e-12, %v59_v29  ;;  %v72_v43 = vadd.f32 1e-12, %v60_v31 }
   0xb   :  { %v67_v40 = vadd.f32 %v63_v34, %v33_v25  ;;  %v68_v42 = vadd.f32 %v64_v35, %v34_v30  ;;  %v23_v52 = vmul.f32 %v19_v4, %v15_v0  ;;  %v45_v53 = vmul.f32 %v132_v21, %v128_v10  ;;  %v93_v0 = vld [vmem:[%s243_s2] sm:$0xff]  ;;  %v95_v10 = vld [vmem:[%s243_s2 + $0x10] sm:$0xff] }
   0xc   :  { %v73_v44 = vadd.f32 1e-12, %v65_v38  ;;  %v74_v45 = vadd.f32 1e-12, %v66_v39  ;;  %v24_v54 = vmul.f32 %v20_v5, %v16_v1  ;;  %v46_v55 = vmul.f32 %v133_v22, %v129_v12 }
   0xd   :  { %v75_v46 = vadd.f32 1e-12, %v67_v40  ;;  %v76_v47 = vadd.f32 1e-12, %v68_v42  ;;  %v25_v56 = vmul.f32 %v21_v6, %v17_v2  ;;  %v47_v57 = vmul.f32 %v134_v23, %v130_v13  ;;  %v94_v2 = vld [vmem:[%s243_s2 + $0x8] sm:$0xff]  ;;  %v96_v13 = vld [vmem:[%s243_s2 + $0x18] sm:$0xff] }
   0xe   :  { %v77_v48 = vmul.f32 %v73_v44, %v69_v36  ;;  %v78_v49 = vmul.f32 %v74_v45, %v70_v37  ;;  %v26_v58 = vmul.f32 %v22_v15, %v18_v3  ;;  %v48_v59 = vmul.f32 %v135_v26, %v131_v14  ;;  %s157_s2 = smov [#allocation2]  }
   0xf   :  { %v79_v50 = vmul.f32 %v75_v46, %v71_v41  ;;  %v80_v51 = vmul.f32 %v76_v47, %v72_v43  ;;  %v49_v60 = vadd.f32 %v45_v53, %v23_v52  ;;  %v50_v61 = vadd.f32 %v46_v55, %v24_v54 }
  0x10   :  { %139 = vrsqrt.f32 %v77_v48  ;;  %v51_v62 = vadd.f32 %v47_v57, %v25_v56  ;;  %v52_v7 = vadd.f32 %v48_v59, %v26_v58 }
  0x11   :  { %141 = vrsqrt.f32 %v78_v49 }
  0x12   :  { %143 = vrsqrt.f32 %v79_v50 }
  0x13   :  { %145 = vrsqrt.f32 %v80_v51 }
  0x1d   :  { %v140_v63 = vpop.eup %139 }
  0x1e   :  { %v142_v8 = vpop.eup %141  ;;  %v85_v9 = vmul.f32 %v140_v63, %v49_v60 }
  0x1f   :  { %v144_v11 = vpop.eup %143  ;;  %v86_v16 = vmul.f32 %v142_v8, %v50_v61 }
  0x20   :  { %v146_v4 = vpop.eup %145  ;;  %v87_v1 = vmul.f32 %v144_v11, %v51_v62  ;;  %v89_v5 = vsub.f32 1.0, %v85_v9 }
  0x21   :  { %v88_v3 = vmul.f32 %v146_v4, %v52_v7  ;;  %v90_v6 = vsub.f32 1.0, %v86_v16 }
  0x22   :  { %v91_v12 = vsub.f32 1.0, %v87_v1  ;;  %v97_v14 = vmul.f32 %v93_v0, %v89_v5 }
  0x23   :  { %v92_v15 = vsub.f32 1.0, %v88_v3  ;;  %v98_v17 = vmul.f32 %v94_v2, %v90_v6 }
  0x24   :  { %v99_v18 = vmul.f32 %v95_v10, %v91_v12 }
  0x25   :  { %v100_v19 = vmul.f32 %v96_v13, %v92_v15  ;;  %v101_v20 = vadd.f32 %v98_v17, %v97_v14 }
  0x27   :  { %v102_v21 = vadd.f32 %v101_v20, %v99_v18 }
  0x29   :  { %v103_v22 = vadd.f32 %v102_v21, %v100_v19 }
  0x2b   :  { %104 = vadd.xlane.f32.xlu0 %v103_v22 }
  0xb4   :  { %v105_v23 = vpop.xlane.xlu0 %104 }
  0xb5   :  { %v106_v24 = vrot.slane %v105_v23, 4 }
  0xb7   :  { %v107_v25 = vadd.f32 %v106_v24, %v105_v23 }
  0xb9   :  { %v108_v26 = vrot.slane %v107_v25, 2 }
  0xbb   :  { %v109_v27 = vadd.f32 %v108_v26, %v107_v25 }
  0xbd   :  { %v110_v28 = vrot.slane %v109_v27, 1 }
  0xbf   :  { %v111_v29 = vadd.f32 %v110_v28, %v109_v27 }
  0xc1   :  { %136 = vpush %v111_v29 }
  0xf2   :  { %s137_s23 = spop %136 }
  0xf3   :  { %114 = sst [smem:[#allocation2]] %s137_s23 }
  0xf4   :  { %122 = dma.smem_to_hbm %s157_s2, 16, %s244_s3, [#allocation3]  }
  0xf5   :  { %155 = dma.done.wait [#allocation3], 16  }
  0xf6   :  { %156 = vsyncadd [#allocation3], 4294967280 }
  0xf7   :  { %126 = sfence }
  0xf8   :  { %127 = vsyncpa [#allocation3], 1 }

</bundles_post_ra>
